<compile_context>
chip_gen: v6e
topology: v6e:2x2x1
jax: 0.10.0
libtpu: 0.0.40
codegen_flags: <defaults>
</compile_context>

<pallas_src>
from typing import Optional, Sequence, Union
import math

import jax
import jax.numpy as jnp
from jax.experimental import pallas as pl
from jax.experimental.pallas import tpu as pltpu

ShapeLike = Union[int, Sequence[int]]

LANE = 128
TARGET_BLOCK_BYTES = 2 * 1024 * 1024   # ~2 MiB blocks: >=85% HBM roofline, safe on all gens
VMEM_LIMIT_BYTES = 32 * 1024 * 1024    # explicit scoped-VMEM limit (4 live buffers << 32 MiB)


class ReshapeException(Exception):
    """Error type for when reshape validation fails (mirrors the torch module)."""

    def __init__(self, reason: str, task: Optional[str] = None):
        msg = "ReshapeException: " + reason
        if task is not None:
            msg += f"\nThis occurred while: {task}"
        super().__init__(msg)


def _standardize_shape(shape: ShapeLike, name: str) -> tuple:
    if isinstance(shape, int):
        shape = (shape,)
    shape = tuple(int(s) for s in shape)
    if any(s < 0 for s in shape):
        raise ReshapeException(f"Param '{name}' must be non-negative")
    return shape


def _validate_dense_reshape(tensor, input_shape, output_shape, task):
    if tensor.ndim - len(input_shape) < 0:
        raise ReshapeException(
            f"Rank of tensor parameter insufficient for resize: tensor has rank "
            f"{tensor.ndim}, but 'input_shape' is {len(input_shape)} units long.",
            task,
        )
    if tuple(tensor.shape[-len(input_shape):]) != tuple(input_shape):
        raise ReshapeException(
            f"Param 'tensor' shape {tuple(tensor.shape)} cannot be broadcast with "
            f"input_shape {tuple(input_shape)}.",
            task,
        )
    if math.prod(input_shape) != math.prod(output_shape):
        raise ReshapeException(
            f"Reshape impossible with unequal number of elements: "
            f"{math.prod(input_shape)} vs {math.prod(output_shape)}.",
            task,
        )


# ----------------------------------------------------------------------------
# Pallas copy kernel (the only data path of a reshape)
# ----------------------------------------------------------------------------

def _copy_kernel(x_ref, o_ref):
    # Pure data movement; output block == input block.
    o_ref[...] = x_ref[...]


def _sublane_pack(dtype) -> int:
    """Rows-per-packed-tile for the dtype: f32 -> 8, bf16/f16 -> 16, int8/fp8 -> 32."""
    itemsize = jnp.dtype(dtype).itemsize
    return max(8, 32 // max(1, itemsize))


def _pallas_copy(flat_2d: jax.Array, *, target_block_bytes: int = TARGET_BLOCK_BYTES) -> jax.Array:
    """Tiled, aliased Pallas copy of a lane-dense (rows, 128) slab.

    rows must be a multiple of the dtype's packed sublane count.
    """
    rows, lanes = flat_2d.shape
    itemsize = jnp.dtype(flat_2d.dtype).itemsize
    pack = _sublane_pack(flat_2d.dtype)

    # Fixed large tile + cdiv grid; the last block may be partial (masked by Pallas).
    target_rows = (target_block_bytes // (lanes * itemsize)) // pack * pack
    target_rows = max(pack, target_rows)
    tile_rows = min(target_rows, rows)          # rows is already a multiple of `pack`
    grid = (pl.cdiv(rows, tile_rows),)

    return pl.pallas_call(
        _copy_kernel,
        out_shape=jax.ShapeDtypeStruct((rows, lanes), flat_2d.dtype),
        grid=grid,
        in_specs=[pl.BlockSpec((tile_rows, lanes), lambda i: (i, 0))],
        out_specs=pl.BlockSpec((tile_rows, lanes), lambda i: (i, 0)),
        # Alias input 0 -> output 0: no second full-size HBM allocation.
        input_output_aliases={0: 0},
        compiler_params=pltpu.CompilerParams(
            dimension_semantics=("parallel",),   # lets v7x shard the grid across 2 TCs
            vmem_limit_bytes=VMEM_LIMIT_BYTES,
        ),
    )(flat_2d)


# ----------------------------------------------------------------------------
# Public API
# ----------------------------------------------------------------------------

def pallas_reshape(
    tensor: jax.Array,
    input_shape: ShapeLike,
    output_shape: ShapeLike,
    validate: bool = True,
    task: Optional[str] = None,
) -> jax.Array:
    """Broadcastable dense reshape; element copy runs through a Pallas kernel when
    the buffer is lane/sublane aligned, otherwise falls back to metadata-only reshape."""
    input_shape = _standardize_shape(input_shape, "input_shape")
    output_shape = _standardize_shape(output_shape, "output_shape")

    # TODO(synk): sparse COO reshape (_sparse_reshape / validate_sparse_reshape) has no
    # clean Pallas/JAX equivalent here; only the dense path is implemented.
    if validate:
        _validate_dense_reshape(tensor, input_shape, output_shape, task)

    broadcast_length = len(input_shape)
    static_shape = (
        tuple(tensor.shape[:-broadcast_length]) if broadcast_length > 0 else tuple(tensor.shape)
    )
    final_shape = static_shape + output_shape

    total = math.prod(tensor.shape) if tensor.ndim > 0 else 1
    if total == 0:
        return jnp.reshape(tensor, final_shape)

    pack = _sublane_pack(tensor.dtype)
    if total % (pack * LANE) == 0:
        # Lane-dense slab; rows is a multiple of the packed sublane tile.
        flat = jnp.reshape(tensor, (total // LANE, LANE))
        out = _pallas_copy(flat)
        return jnp.reshape(out, final_shape)

    # Unaligned element count: reshape is metadata-only anyway; avoid the old
    # single-giant-block fallback (VMEM OOM cliff for large odd sizes).
    return jnp.reshape(tensor, final_shape)


class Reshape:
    """JAX/Pallas analogue of the torch Reshape module: configure once, reshape repeatedly."""

    def __init__(
        self,
        input_shape: ShapeLike,
        output_shape: ShapeLike,
        validate: bool = True,
        task: Optional[str] = None,
    ):
        self.input_shape = _standardize_shape(input_shape, "input_shape")
        self.output_shape = _standardize_shape(output_shape, "output_shape")
        self.validate = validate
        self.task = task

    def __call__(self, tensor: jax.Array) -> jax.Array:
        return pallas_reshape(tensor, self.input_shape, self.output_shape, self.validate, self.task)


if __name__ == "__main__":
    key = jax.random.PRNGKey(0)

    # 1) Main case: reshape [..., 16, 16] -> [..., 256] on f32 (Pallas copy path).
    x = jax.random.normal(key, (2, 4, 16, 16), dtype=jnp.float32)
    layer = Reshape(input_shape=[16, 16], output_shape=[256], validate=True, task="testing reshape")
    y = jax.block_until_ready(layer(x))
    ref = jnp.reshape(x, (2, 4, 256))
    assert y.shape == (2, 4, 256), y.shape
    assert y.dtype == x.dtype
    assert bool(jnp.array_equal(y, ref)), "Pallas reshape mismatch vs reference (f32)"

    # 2) Packed dtype (bf16 -> 16-row packed sublane tile) through the Pallas path.
    xb = jax.random.normal(key, (2, 8, 16, 16), dtype=jnp.float32).astype(jnp.bfloat16)
    yb = jax.block_until_ready(pallas_reshape(xb, [8, 16, 16], [2048]))
    assert yb.shape == (2, 2048)
    assert bool(jnp.array_equal(yb, jnp.reshape(xb, (2, 2048)))), "bf16 mismatch"

    # 3) Ragged cdiv-grid exercise: rows=24, tile_rows=16 -> partial (masked) tail block.
    xr = jax.random.normal(key, (24, 128), dtype=jnp.float32)
    yr = jax.block_until_ready(_pallas_copy(xr, target_block_bytes=16 * 128 * 4))
    assert bool(jnp.array_equal(yr, xr)), "ragged-grid copy mismatch"

    # 4) Unaligned element count: falls back to metadata-only jnp.reshape.
    x2 = jax.random.normal(key, (3, 5, 6), dtype=jnp.float32)
    y2 = jax.block_until_ready(pallas_reshape(x2, [5, 6], [30]))
    assert y2.shape == (3, 30)
    assert bool(jnp.array_equal(y2, jnp.reshape(x2, (3, 30))))

    print("KERNEL_OK")
</pallas_src>

<mosaic_0001>
module attributes {stable_mosaic.version = 11 : i64} {
  func.func @_copy_kernel(%arg0: i32, %arg1: memref<16x128xf32, #tpu.memory_space<vmem>>, %arg2: memref<16x128xf32, #tpu.memory_space<vmem>>) attributes {dimension_semantics = [#tpu.dimension_semantics<parallel>], iteration_bounds = array<i64: 1>, scalar_prefetch = 0 : i64, scratch_operands = 0 : i64, tpu.core_type = #tpu.core_type<tc>, window_params = [{transform_indices = @transform_0, window_bounds = array<i64: 16, 128>}, {transform_indices = @transform_1, window_bounds = array<i64: 16, 128>}]} {
    %c0 = arith.constant 0 : index
    %c0_0 = arith.constant 0 : index
    %0 = vector.load %arg1[%c0, %c0_0] : memref<16x128xf32, #tpu.memory_space<vmem>>, vector<16x128xf32>
    %c0_1 = arith.constant 0 : index
    %c0_2 = arith.constant 0 : index
    %1 = vector.load %arg2[%c0_1, %c0_2] : memref<16x128xf32, #tpu.memory_space<vmem>>, vector<16x128xf32>
    tpu.vector_store %arg2[%c0_1, %c0_2], %0 {strides = array<i32>} : memref<16x128xf32, #tpu.memory_space<vmem>>, vector<16x128xf32>,
    return
  }
  func.func @transform_0(%arg0: i32) -> (i32, i32) {
    %c0_i32 = arith.constant 0 : i32
    %c0_i32_0 = arith.constant 0 : i32
    return %arg0, %c0_i32 : i32, i32
  }
  func.func @transform_1(%arg0: i32) -> (i32, i32) {
    %c0_i32 = arith.constant 0 : i32
    %c0_i32_0 = arith.constant 0 : i32
    return %arg0, %c0_i32 : i32, i32
  }
}

</mosaic_0001>

<bundles_post_ra>
// kernel: tpu_custom_call.1
= control target key start
LH: loop header
LB: loop body
LE: loop exit
PB: predicated region body
PF: predicated region fallthrough
CT: control target
= control target key end

     0   :  { %6 = vsyncpa [#allocation3], 0  ;;  %s112_s0 = inlined_call_operand.hbm [shape: f32[16,128], index: 0, kind: input, shape index: {}, may-alias: {0,1}]   ;;  %s113_s1 = inlined_call_operand.hbm [shape: f32[16,128], index: 1, kind: output, shape index: {}, may-alias: {0,1}]  }
   0x1   :  { %7 = vsyncpa [#allocation4], 0  ;;  %s92_s6 = smov [#allocation2]  }
   0x2   :  { %s13_s7 = sshll.u32 %s92_s6, 4  ;;  %s14_s7 = int_to_ptr.vmem [resolvable:$true] %s13_s7 }
   0x3   :  { %s56_s8 = scalar_lea.vmem %s14_s7, 256  ;;  %p61_p1 = scmp.lt.s32.totalorder %s14_s7, %s14_s7 }
   0x4   :  { %p57_p0 = scmp.ne.s32.totalorder %s14_s7, %s56_s8  ;;  %p62_p2 = scmp.lt.s32.totalorder %s56_s8, %s56_s8 }
   0x6   :  { %p63_p3 = por %p62_p2, %p61_p1 }
   0x8   :  { %p64_p4 = pnand %p63_p3, %p57_p0 }
   0xa   :  { %67 = shalt.err (!%p64_p4)
}
   0xb   :  { %s93_s9 = smov 128   ;;  %s94_s10 = smov 8  }
   0xc   :  { %19 = dma.hbm_to_vmem [thread:$0]  %s112_s0, 256, %s14_s7, [#allocation3], %s93_s9, %s93_s9, %s94_s10  }
   0xd   :  { %88 = dma.done.wait [#allocation3], 256  }
   0xe   :  { %89 = vsyncadd [#allocation3], 4294967040  ;;  %s95_s13 = smov [#allocation5]   ;;  %v23_v0 = vld [vmem:[#allocation2] sm:$0xff]  ;;  %v24_v1 = vld [vmem:[#allocation2 + $0x8] sm:$0xff] }
   0xf   :  { %s32_s14 = sshll.u32 %s95_s13, 4  ;;  %25 = vst [vmem:[#allocation5] sm:$0xff] %v23_v0  ;;  %26 = vst [vmem:[#allocation5 + $0x8] sm:$0xff] %v24_v1  ;;  %s33_s14 = int_to_ptr.vmem [resolvable:$true] %s32_s14 }
  0x10   :  { %s68_s15 = scalar_lea.vmem %s33_s14, 256  ;;  %p73_p6 = scmp.lt.s32.totalorder %s33_s14, %s33_s14 }
  0x11   :  { %p69_p5 = scmp.ne.s32.totalorder %s33_s14, %s68_s15  ;;  %p74_p7 = scmp.lt.s32.totalorder %s68_s15, %s68_s15 }
  0x13   :  { %p75_p8 = por %p74_p7, %p73_p6 }
  0x15   :  { %p76_p9 = pnand %p75_p8, %p69_p5 }
  0x17   :  { %79 = shalt.err (!%p76_p9)
}
  0x18   :  { %38 = dma.vmem_to_hbm [thread:$0]  %s33_s14, 256, %s113_s1, [#allocation4], %s93_s9, %s93_s9, %s94_s10  }
  0x19   :  { %90 = dma.done.wait [#allocation4], 256  }
  0x1a   :  { %91 = vsyncadd [#allocation4], 4294967040 }
  0x1b   :  { %42 = vsyncpa [#allocation3], 1 }
  0x1c   :  { %43 = vsyncpa [#allocation4], 1 }

</bundles_post_ra>
